<compile_context>
chip_gen: v7x
topology: tpu7x:2x2x1
jax: 0.10.0
libtpu: 0.0.40
codegen_flags: <defaults>
</compile_context>

<pallas_src>
import functools

import jax
import jax.numpy as jnp
from jax.experimental import pallas as pl
from jax.experimental.pallas import tpu as pltpu


# ----------------------------------------------------------------------------
# Pallas kernel: framed signal -> windowed DFT (2 matmuls/input) -> |mag diff|
# accumulated into a lane-parallel (8, NF) VMEM tile, one output block per core
# ----------------------------------------------------------------------------
def _stft_mag_l1_kernel(xf_ref, yf_ref, bc_ref, bs_ref, out_ref, acc_ref):
    k = pl.program_id(1)                     # inner (reduction) axis

    @pl.when(k == 0)
    def _():
        acc_ref[...] = jnp.zeros_like(acc_ref)

    xf = xf_ref[...]                         # (TM, NFFT) framed x
    yf = yf_ref[...]                         # (TM, NFFT) framed y
    bc = bc_ref[...]                         # (NFFT, NF) window-folded cos basis
    bs = bs_ref[...]                         # (NFFT, NF) window-folded -sin basis

    xr = jnp.dot(xf, bc, preferred_element_type=jnp.float32)
    xi = jnp.dot(xf, bs, preferred_element_type=jnp.float32)
    yr = jnp.dot(yf, bc, preferred_element_type=jnp.float32)
    yi = jnp.dot(yf, bs, preferred_element_type=jnp.float32)

    x_mag = jnp.sqrt(jnp.maximum(xr * xr + xi * xi, 1e-7))
    y_mag = jnp.sqrt(jnp.maximum(yr * yr + yi * yi, 1e-7))
    d = jnp.abs(x_mag - y_mag)               # (TM, NF); padded rows/cols are 0

    tm, nf = d.shape                         # TM is a multiple of 8
    # VPU-only partial reduction: sum whole vregs into the (8, NF) accumulator.
    acc_ref[...] += jnp.sum(d.reshape(tm // 8, 8, nf), axis=0)

    @pl.when(k == pl.num_programs(1) - 1)
    def _():
        out_ref[...] = acc_ref[...]          # per-core partial (8, NF) tile


# ----------------------------------------------------------------------------
# Host-side helpers: framing (torch.stft center/reflect), window-folded bases
# ----------------------------------------------------------------------------
def _round_up(a, b):
    return ((a + b - 1) // b) * b


def _hann_window_periodic(n, dtype=jnp.float32):
    # torch.hann_window default: periodic=True
    k = jnp.arange(n, dtype=dtype)
    return 0.5 - 0.5 * jnp.cos(2.0 * jnp.pi * k / n)


def _frame_signal(sig, n_fft, hop):
    # torch.stft defaults: center=True with reflect padding of n_fft//2 each side
    pad = n_fft // 2
    sig = jnp.pad(sig, ((0, 0), (pad, pad)), mode="reflect")
    B, Tp = sig.shape
    n_frames = (Tp - n_fft) // hop + 1
    idx = jnp.arange(n_frames)[:, None] * hop + jnp.arange(n_fft)[None, :]
    return sig[:, idx], n_frames                    # (B, n_frames, n_fft)


def _windowed_dft_bases(n_fft, win_length, n_freq_pad, dtype=jnp.float32):
    # Hann(win_length), zero-padded (centered) to n_fft, folded into the bases:
    #   bc[m,k] =  w[m] * cos(2*pi*m*k/n_fft)
    #   bs[m,k] = -w[m] * sin(2*pi*m*k/n_fft)
    # Columns >= n_fft//2+1 are zeroed so padded freq lanes contribute 0 loss.
    w = _hann_window_periodic(win_length, dtype)
    lpad = (n_fft - win_length) // 2
    w_full = jnp.zeros((n_fft,), dtype).at[lpad:lpad + win_length].set(w)

    m = jnp.arange(n_fft, dtype=dtype)[:, None]
    k = jnp.arange(n_freq_pad, dtype=dtype)[None, :]
    ang = 2.0 * jnp.pi * m * k / n_fft
    n_freq = n_fft // 2 + 1
    mask = (jnp.arange(n_freq_pad) < n_freq)[None, :]
    bc = jnp.where(mask, w_full[:, None] * jnp.cos(ang), 0.0)
    bs = jnp.where(mask, -w_full[:, None] * jnp.sin(ang), 0.0)
    return bc.astype(dtype), bs.astype(dtype)


# ----------------------------------------------------------------------------
# pallas_call wrapper
# ----------------------------------------------------------------------------
@functools.partial(jax.jit, static_argnames=("fft_size", "shift_size", "win_length"))
def stft_mag_domain_loss(x, y, *, fft_size=1024, shift_size=120, win_length=600):
    """STFT-magnitude-domain L1 loss between predicted x (B, T) and target y (B, T)."""
    assert x.shape == y.shape and x.ndim == 2

    x = x.astype(jnp.float32)
    y = y.astype(jnp.float32)

    n_freq = fft_size // 2 + 1
    nf_pad = _round_up(n_freq, 128)

    xf, n_frames = _frame_signal(x, fft_size, shift_size)      # (B, F, NFFT)
    yf, _ = _frame_signal(y, fft_size, shift_size)
    B = x.shape[0]
    M = B * n_frames
    xf = xf.reshape(M, fft_size)
    yf = yf.reshape(M, fft_size)

    # --- tile sizing -------------------------------------------------------
    NCORES = 2  # v7x megacore split; serial (and harmless) on v5e / v6e.
    # Keep 2 inputs x 2 double-buffers x (TM, NFFT) f32 plus the (possibly
    # double-buffered) bases comfortably under the smallest default scoped-VMEM
    # limit (16 MiB on v5e; v7x has only 64 MiB physical).
    bases_bytes = 2 * 2 * fft_size * nf_pad * 4
    budget = max(1 << 20, (12 << 20) - bases_bytes)
    tm_cap = max(8, (budget // (2 * 2 * fft_size * 4)) // 8 * 8)
    tm_need = _round_up(-(-M // NCORES), 8)
    TM = min(512, tm_cap, tm_need)

    M_pad = _round_up(M, NCORES * TM)
    n_inner = M_pad // (NCORES * TM)
    if M_pad != M:
        # Zero-padded rows give Re=Im=0 for BOTH x and y -> identical clamped
        # magnitudes -> zero contribution to the |x_mag - y_mag| sum.
        pad = ((0, M_pad - M), (0, 0))
        xf = jnp.pad(xf, pad)
        yf = jnp.pad(yf, pad)

    bc, bs = _windowed_dft_bases(fft_size, win_length, nf_pad)

    def row_map(c, k):
        return (c * n_inner + k, 0)

    def basis_map(c, k):        # constant -> Pallas keeps the bases resident
        return (0, 0)

    def out_map(c, k):          # one (8, NF) partial block per parallel core
        return (c, 0)

    partials = pl.pallas_call(
        _stft_mag_l1_kernel,
        out_shape=jax.ShapeDtypeStruct((NCORES * 8, nf_pad), jnp.float32),
        grid_spec=pltpu.PrefetchScalarGridSpec(
            num_scalar_prefetch=0,
            grid=(NCORES, n_inner),
            in_specs=[
                pl.BlockSpec((TM, fft_size), row_map),      # x frames
                pl.BlockSpec((TM, fft_size), row_map),      # y frames
                pl.BlockSpec((fft_size, nf_pad), basis_map),  # cos basis (windowed)
                pl.BlockSpec((fft_size, nf_pad), basis_map),  # sin basis (windowed)
            ],
            out_specs=pl.BlockSpec((8, nf_pad), out_map),
            scratch_shapes=[pltpu.VMEM((8, nf_pad), jnp.float32)],
        ),
        compiler_params=pltpu.CompilerParams(
            dimension_semantics=("parallel", "arbitrary"),
        ),
    )(xf, yf, bc, bs)

    # Final (tiny) cross-lane reduce on the host; mean over real elements only.
    abs_sum = jnp.sum(partials)
    return abs_sum / jnp.float32(M * n_freq)


# ----------------------------------------------------------------------------
# Pure-JAX reference for validation
# ----------------------------------------------------------------------------
def _reference_loss(x, y, *, fft_size, shift_size, win_length):
    n_freq = fft_size // 2 + 1
    bc, bs = _windowed_dft_bases(fft_size, win_length, n_freq)

    def stft_mag(sig):
        frames, _ = _frame_signal(sig.astype(jnp.float32), fft_size, shift_size)
        re = jnp.einsum("bfn,nk->bfk", frames, bc,
                        precision=jax.lax.Precision.HIGHEST)
        im = jnp.einsum("bfn,nk->bfk", frames, bs,
                        precision=jax.lax.Precision.HIGHEST)
        mag = jnp.sqrt(jnp.maximum(re * re + im * im, 1e-7))
        return jnp.swapaxes(mag, -1, -2)     # (B, n_freq, n_frames) as in torch

    xm = stft_mag(x)
    ym = stft_mag(y)
    return jnp.mean(jnp.abs(xm - ym))


if __name__ == "__main__":
    key = jax.random.PRNGKey(0)
    kx, ky = jax.random.split(key)

    B, T = 2, 512
    fft_size, shift_size, win_length = 128, 32, 96   # scaled-down module config

    x = jax.random.normal(kx, (B, T), dtype=jnp.float32)
    y = jax.random.normal(ky, (B, T), dtype=jnp.float32)

    loss = stft_mag_domain_loss(
        x, y, fft_size=fft_size, shift_size=shift_size, win_length=win_length
    )
    loss = jax.block_until_ready(loss)

    ref = _reference_loss(
        x, y, fft_size=fft_size, shift_size=shift_size, win_length=win_length
    )
    ref = jax.block_until_ready(ref)

    assert jnp.allclose(loss, ref, rtol=1e-3, atol=1e-3), (loss, ref)
    print("KERNEL_OK")
</pallas_src>

<mosaic_0001>
module attributes {stable_mosaic.version = 11 : i64} {
  func.func @_stft_mag_l1_kernel(%arg0: i32, %arg1: i32, %arg2: memref<24x128xf32, #tpu.memory_space<vmem>>, %arg3: memref<24x128xf32, #tpu.memory_space<vmem>>, %arg4: memref<128x128xf32, #tpu.memory_space<vmem>>, %arg5: memref<128x128xf32, #tpu.memory_space<vmem>>, %arg6: memref<8x128xf32, #tpu.memory_space<vmem>>, %arg7: memref<8x128xf32, #tpu.memory_space<vmem>>) attributes {dimension_semantics = [#tpu.dimension_semantics<parallel>, #tpu.dimension_semantics<arbitrary>], iteration_bounds = array<i64: 2, 1>, scalar_prefetch = 0 : i64, scratch_operands = 1 : i64, tpu.core_type = #tpu.core_type<tc>, window_params = [{transform_indices = @transform_0, window_bounds = array<i64: 24, 128>}, {transform_indices = @transform_1, window_bounds = array<i64: 24, 128>}, {pipeline_mode = #tpu.pipeline_mode<synchronous>, transform_indices = @transform_2, window_bounds = array<i64: 128, 128>}, {pipeline_mode = #tpu.pipeline_mode<synchronous>, transform_indices = @transform_3, window_bounds = array<i64: 128, 128>}, {transform_indices = @transform_4, window_bounds = array<i64: 8, 128>}]} {
    %c0_i32 = arith.constant 0 : i32
    %0 = arith.cmpi eq, %arg1, %c0_i32 : i32
    %1 = arith.extui %0 : i1 to i32
    %c0_i32_0 = arith.constant 0 : i32
    %2 = arith.cmpi ne, %1, %c0_i32_0 : i32
    scf.if %2 {
      %cst_20 = arith.constant 0.000000e+00 : f32
      %33 = vector.broadcast %cst_20 : f32 to vector<8x128xf32>
      %c0_21 = arith.constant 0 : index
      %c0_22 = arith.constant 0 : index
      %34 = vector.load %arg7[%c0_21, %c0_22] : memref<8x128xf32, #tpu.memory_space<vmem>>, vector<8x128xf32>
      tpu.vector_store %arg7[%c0_21, %c0_22], %33 {strides = array<i32>} : memref<8x128xf32, #tpu.memory_space<vmem>>, vector<8x128xf32>,
    } else {
    }
    %c0 = arith.constant 0 : index
    %c0_1 = arith.constant 0 : index
    %3 = vector.load %arg2[%c0, %c0_1] : memref<24x128xf32, #tpu.memory_space<vmem>>, vector<24x128xf32>
    %c0_2 = arith.constant 0 : index
    %c0_3 = arith.constant 0 : index
    %4 = vector.load %arg3[%c0_2, %c0_3] : memref<24x128xf32, #tpu.memory_space<vmem>>, vector<24x128xf32>
    %c0_4 = arith.constant 0 : index
    %c0_5 = arith.constant 0 : index
    %5 = vector.load %arg4[%c0_4, %c0_5] : memref<128x128xf32, #tpu.memory_space<vmem>>, vector<128x128xf32>
    %c0_6 = arith.constant 0 : index
    %c0_7 = arith.constant 0 : index
    %6 = vector.load %arg5[%c0_6, %c0_7] : memref<128x128xf32, #tpu.memory_space<vmem>>, vector<128x128xf32>
    %cst = arith.constant dense<0.000000e+00> : vector<24x128xf32>
    %7 = tpu.matmul %3, %5, %cst {dimension_numbers = #tpu.dot_dimension_numbers<[1], [0], [0], [1], [0, 0, 1, 1], [], []>} : vector<24x128xf32>, vector<128x128xf32>, vector<24x128xf32> -> vector<24x128xf32>
    %cst_8 = arith.constant dense<0.000000e+00> : vector<24x128xf32>
    %8 = tpu.matmul %3, %6, %cst_8 {dimension_numbers = #tpu.dot_dimension_numbers<[1], [0], [0], [1], [0, 0, 1, 1], [], []>} : vector<24x128xf32>, vector<128x128xf32>, vector<24x128xf32> -> vector<24x128xf32>
    %cst_9 = arith.constant dense<0.000000e+00> : vector<24x128xf32>
    %9 = tpu.matmul %4, %5, %cst_9 {dimension_numbers = #tpu.dot_dimension_numbers<[1], [0], [0], [1], [0, 0, 1, 1], [], []>} : vector<24x128xf32>, vector<128x128xf32>, vector<24x128xf32> -> vector<24x128xf32>
    %cst_10 = arith.constant dense<0.000000e+00> : vector<24x128xf32>
    %10 = tpu.matmul %4, %6, %cst_10 {dimension_numbers = #tpu.dot_dimension_numbers<[1], [0], [0], [1], [0, 0, 1, 1], [], []>} : vector<24x128xf32>, vector<128x128xf32>, vector<24x128xf32> -> vector<24x128xf32>
    %11 = arith.mulf %7, %7 : vector<24x128xf32>
    %12 = arith.mulf %8, %8 : vector<24x128xf32>
    %13 = arith.addf %11, %12 : vector<24x128xf32>
    %cst_11 = arith.constant 1.000000e-07 : f32
    %14 = vector.broadcast %cst_11 : f32 to vector<24x128xf32>
    %15 = arith.maximumf %13, %14 : vector<24x128xf32>
    %16 = math.sqrt %15 : vector<24x128xf32>
    %17 = arith.mulf %9, %9 : vector<24x128xf32>
    %18 = arith.mulf %10, %10 : vector<24x128xf32>
    %19 = arith.addf %17, %18 : vector<24x128xf32>
    %cst_12 = arith.constant 1.000000e-07 : f32
    %20 = vector.broadcast %cst_12 : f32 to vector<24x128xf32>
    %21 = arith.maximumf %19, %20 : vector<24x128xf32>
    %22 = math.sqrt %21 : vector<24x128xf32>
    %23 = arith.subf %16, %22 : vector<24x128xf32>
    %24 = math.absf %23 : vector<24x128xf32>
    %c0_13 = arith.constant 0 : index
    %c0_14 = arith.constant 0 : index
    %25 = vector.load %arg7[%c0_13, %c0_14] : memref<8x128xf32, #tpu.memory_space<vmem>>, vector<8x128xf32>
    %26 = vector.shape_cast %24 : vector<24x128xf32> to vector<3x8x128xf32>
    %cst_15 = arith.constant dense<0.000000e+00> : vector<8x128xf32>
    %27 = vector.multi_reduction <add>, %26, %cst_15 [0] : vector<3x8x128xf32> to vector<8x128xf32>
    %28 = arith.addf %25, %27 : vector<8x128xf32>
    %c0_16 = arith.constant 0 : index
    %c0_17 = arith.constant 0 : index
    %29 = vector.load %arg7[%c0_16, %c0_17] : memref<8x128xf32, #tpu.memory_space<vmem>>, vector<8x128xf32>
    tpu.vector_store %arg7[%c0_16, %c0_17], %28 {strides = array<i32>} : memref<8x128xf32, #tpu.memory_space<vmem>>, vector<8x128xf32>,
    %c0_i32_18 = arith.constant 0 : i32
    %30 = arith.cmpi eq, %arg1, %c0_i32_18 : i32
    %31 = arith.extui %30 : i1 to i32
    %c0_i32_19 = arith.constant 0 : i32
    %32 = arith.cmpi ne, %31, %c0_i32_19 : i32
    scf.if %32 {
      %c0_20 = arith.constant 0 : index
      %c0_21 = arith.constant 0 : index
      %33 = vector.load %arg7[%c0_20, %c0_21] : memref<8x128xf32, #tpu.memory_space<vmem>>, vector<8x128xf32>
      %c0_22 = arith.constant 0 : index
      %c0_23 = arith.constant 0 : index
      %34 = vector.load %arg6[%c0_22, %c0_23] : memref<8x128xf32, #tpu.memory_space<vmem>>, vector<8x128xf32>
      tpu.vector_store %arg6[%c0_22, %c0_23], %33 {strides = array<i32>} : memref<8x128xf32, #tpu.memory_space<vmem>>, vector<8x128xf32>,
    } else {
    }
    return
  }
  func.func @transform_0(%arg0: i32, %arg1: i32) -> (i32, i32) {
    %c1_i32 = arith.constant 1 : i32
    %0 = arith.muli %arg0, %c1_i32 : i32
    %1 = arith.addi %0, %arg1 : i32
    %c0_i32 = arith.constant 0 : i32
    %c0_i32_0 = arith.constant 0 : i32
    return %1, %c0_i32 : i32, i32
  }
  func.func @transform_1(%arg0: i32, %arg1: i32) -> (i32, i32) {
    %c1_i32 = arith.constant 1 : i32
    %0 = arith.muli %arg0, %c1_i32 : i32
    %1 = arith.addi %0, %arg1 : i32
    %c0_i32 = arith.constant 0 : i32
    %c0_i32_0 = arith.constant 0 : i32
    return %1, %c0_i32 : i32, i32
  }
  func.func @transform_2(%arg0: i32, %arg1: i32) -> (i32, i32) {
    %c0_i32 = arith.constant 0 : i32
    %c0_i32_0 = arith.constant 0 : i32
    %c0_i32_1 = arith.constant 0 : i32
    return %c0_i32, %c0_i32_0 : i32, i32
  }
  func.func @transform_3(%arg0: i32, %arg1: i32) -> (i32, i32) {
    %c0_i32 = arith.constant 0 : i32
    %c0_i32_0 = arith.constant 0 : i32
    %c0_i32_1 = arith.constant 0 : i32
    return %c0_i32, %c0_i32_0 : i32, i32
  }
  func.func @transform_4(%arg0: i32, %arg1: i32) -> (i32, i32) {
    %c0_i32 = arith.constant 0 : i32
    %c0_i32_0 = arith.constant 0 : i32
    return %arg0, %c0_i32 : i32, i32
  }
}

</mosaic_0001>

<bundles_post_ra>
// kernel: stft_mag_domain_loss.1
= control target key start
LH: loop header
LB: loop body
LE: loop exit
PB: predicated region body
PF: predicated region fallthrough
CT: control target
= control target key end

     0   :  { %s1201_s15 = smov 0   ;;  %s1203_s16 = smov 0   ;;  %s1459_s0 = inlined_call_operand.vmem [shape: f32[48,128], index: 0, kind: input, shape index: {}]   ;;  %s1460_s1 = inlined_call_operand.vmem [shape: f32[48,128], index: 1, kind: input, shape index: {}]   ;;  %s1461_s2 = inlined_call_operand.vmem [shape: f32[128,128], index: 2, kind: input, shape index: {}]   ;;  %s1462_s3 = inlined_call_operand.vmem [shape: f32[128,128], index: 3, kind: input, shape index: {}]   ;;  %s1463_s4 = inlined_call_operand.vmem [shape: f32[16,128], index: 4, kind: output, shape index: {}]  }
   0x1   :  { %s1205_s17 = smov 0  }
   0x2 LB: > { %s26_s18 = sadd.s32 1, %s1167_s16  ;;  %p768_p0 = scmp.ge.s32.totalorder %s1171_s17, 1  ;;  %s1171_s17 = sphi %s1205_s17, %s14_s17   ;;  %s1167_s16 = sphi %s1203_s16, %s1465_s16   ;;  %s1163_s15 = sphi %s1201_s15, %s1464_s15  }
   0x3   : > { %p28_p1 = scmp.ge.s32.totalorder %s26_s18, 2  ;;  %p194_p2 = scmp.lt.s32.totalorder %s1171_s17, 3 }
   0x5   : > { %s1467_s18 = smov (%p28_p1, %s26_s18), 0  ;;  %p195_p3 = pnand %p768_p0, %p194_p2 }
   0x6   : > { %v257_v0 = vld [vmem:[%s1461_s2] sm:$0xff] (!%p195_p3)  ;;  %v258_v1 = vld [vmem:[%s1461_s2 + $0x8] sm:$0xff] (!%p195_p3)  ;;  %v1173_v3 = vmov (!%p195_p3), 0.0|0.0   ;;  %v259_v6 = vld [vmem:[%s1461_s2 + $0x10] sm:$0xff] (!%p195_p3)  ;;  %vm1174_vm0 = vmmov (!%p195_p3), 0   ;;  %v1175_v11 = vmov (!%p195_p3), 0.0  }
   0x7   : > { %198 = sbr.rel (%p195_p3) target bundleno = 321 (0x141), region = 36  ;;  %v273_v2 = vld [vmem:[%s1462_s3] sm:$0xff] (!%p195_p3)  ;;  %1014 = vmatprep.subr.bf16.mxu0 (!%p195_p3), %v1173_v3  ;;  %1038 = vmatprep.subr.bf16.mxu1 (!%p195_p3), %v1173_v3  ;;  %v1232_v4 = vpack.c.bf16 (!%p195_p3), %v258_v1, %v257_v0  ;;  %v274_v5 = vld [vmem:[%s1462_s3 + $0x8] sm:$0xff] (!%p195_p3)  ;;  %v260_v7 = vld [vmem:[%s1461_s2 + $0x18] sm:$0xff] (!%p195_p3)  ;;  %p242_p5 = scmp.lt.s32.totalorder (!%p195_p3), %s1163_s15, 1 }
   0x8   : > { %v1243_v8 = vpack.c.bf16 (!%p195_p3), %v274_v5, %v273_v2  ;;  %v275_v9 = vld [vmem:[%s1462_s3 + $0x10] sm:$0xff] (!%p195_p3)  ;;  %v276_v10 = vld [vmem:[%s1462_s3 + $0x18] sm:$0xff] (!%p195_p3)  ;;  %882 = vmatprep.mubr.msk.f32.mxu0 (!%p195_p3), %vm1174_vm0, %v1175_v11  ;;  %923 = vmatprep.mubr.msk.f32.mxu1 (!%p195_p3), %vm1174_vm0, %v1175_v11  ;;  %v1256_v12 = vpack.c.bf16 (!%p195_p3), %v260_v7, %v259_v6  ;;  %v261_v14 = vld [vmem:[%s1461_s2 + $0x20] sm:$0xff] (!%p195_p3)  ;;  %s227_s11 = smul.u32 (!%p195_p3), 3, %s1163_s15 }
   0x9   : > { %1016 = vmatpush3.bf16.msra.mxu0 (!%p195_p3), %v1232_v4  ;;  %v1260_v13 = vpack.c.bf16 (!%p195_p3), %v276_v10, %v275_v9  ;;  %v262_v15 = vld [vmem:[%s1461_s2 + $0x28] sm:$0xff] (!%p195_p3)  ;;  %v277_v16 = vld [vmem:[%s1462_s3 + $0x20] sm:$0xff] (!%p195_p3)  ;;  %v263_v20 = vld [vmem:[%s1461_s2 + $0x30] sm:$0xff] (!%p195_p3) }
   0xa   : > { %1040 = vmatpush3.bf16.msra.mxu1 (!%p195_p3), %v1243_v8  ;;  %1017 = vmatprep.subr.bf16.mxu0 (!%p195_p3), %v1173_v3  ;;  %v278_v17 = vld [vmem:[%s1462_s3 + $0x28] sm:$0xff] (!%p195_p3)  ;;  %v1276_v18 = vpack.c.bf16 (!%p195_p3), %v262_v15, %v261_v14  ;;  %v264_v21 = vld [vmem:[%s1461_s2 + $0x38] sm:$0xff] (!%p195_p3)  ;;  %v279_v22 = vld [vmem:[%s1462_s3 + $0x30] sm:$0xff] (!%p195_p3)  ;;  %p228_p4 = scmp.lt.s32.totalorder (!%p195_p3), %s227_s11, 5 }
   0xb   : > { %1041 = vmatprep.subr.bf16.mxu1 (!%p195_p3), %v1173_v3  ;;  %v1280_v19 = vpack.c.bf16 (!%p195_p3), %v278_v17, %v277_v16  ;;  %v280_v23 = vld [vmem:[%s1462_s3 + $0x38] sm:$0xff] (!%p195_p3)  ;;  %v1296_v24 = vpack.c.bf16 (!%p195_p3), %v264_v21, %v263_v20  ;;  %v265_v26 = vld [vmem:[%s1461_s2 + $0x40] sm:$0xff] (!%p195_p3)  ;;  %v266_v27 = vld [vmem:[%s1461_s2 + $0x48] sm:$0xff] (!%p195_p3) }
   0xc   : > { %v1300_v25 = vpack.c.bf16 (!%p195_p3), %v280_v23, %v279_v22  ;;  %v281_v28 = vld [vmem:[%s1462_s3 + $0x40] sm:$0xff] (!%p195_p3)  ;;  %v282_v29 = vld [vmem:[%s1462_s3 + $0x48] sm:$0xff] (!%p195_p3)  ;;  %v1317_v30 = vpack.c.bf16 (!%p195_p3), %v266_v27, %v265_v26  ;;  %v267_v32 = vld [vmem:[%s1461_s2 + $0x50] sm:$0xff] (!%p195_p3) }
   0xd   : > { %1019 = vmatpush3.bf16.msra.mxu0 (!%p195_p3), %v1256_v12  ;;  %v1321_v31 = vpack.c.bf16 (!%p195_p3), %v282_v29, %v281_v28  ;;  %v268_v33 = vld [vmem:[%s1461_s2 + $0x58] sm:$0xff] (!%p195_p3)  ;;  %v283_v34 = vld [vmem:[%s1462_s3 + $0x50] sm:$0xff] (!%p195_p3)  ;;  %v269_v38 = vld [vmem:[%s1461_s2 + $0x60] sm:$0xff] (!%p195_p3) }
   0xe   : > { %1043 = vmatpush3.bf16.msra.mxu1 %v1260_v13  ;;  %1020 = vmatprep.subr.bf16.mxu0 %v1173_v3  ;;  %v284_v35 = vld [vmem:[%s1462_s3 + $0x58] sm:$0xff]  ;;  %v1337_v36 = vpack.c.bf16 %v268_v33, %v267_v32  ;;  %v270_v39 = vld [vmem:[%s1461_s2 + $0x68] sm:$0xff]  ;;  %v285_v40 = vld [vmem:[%s1462_s3 + $0x60] sm:$0xff]  ;;  %s1469_s11 = smov (!%p228_p4, %s227_s11), 5  ;;  %s1471_s15 = smov (!%p242_p5, %s1163_s15), 1 }
   0xf   : > { %1044 = vmatprep.subr.bf16.mxu1 %v1173_v3  ;;  %v1341_v37 = vpack.c.bf16 %v284_v35, %v283_v34  ;;  %v286_v41 = vld [vmem:[%s1462_s3 + $0x68] sm:$0xff]  ;;  %v1033_v42 = vpack.c.bf16 %v270_v39, %v269_v38  ;;  %v271_v44 = vld [vmem:[%s1461_s2 + $0x70] sm:$0xff]  ;;  %v272_v45 = vld [vmem:[%s1461_s2 + $0x78] sm:$0xff]  ;;  %s769_s19 = sshll.u32 %s1469_s11, 3  ;;  %s771_s11 = sshll.u32 %s1471_s15, 3 }
  0x10   : > { %v1057_v43 = vpack.c.bf16 %v286_v41, %v285_v40  ;;  %v287_v46 = vld [vmem:[%s1462_s3 + $0x70] sm:$0xff]  ;;  %v288_v47 = vld [vmem:[%s1462_s3 + $0x78] sm:$0xff]  ;;  %v1036_v48 = vpack.c.bf16 %v272_v45, %v271_v44  ;;  %s231_s22 = scalar_lea.vmem %s1459_s0, %s769_s19  ;;  %s239_s25 = scalar_lea.vmem %s1460_s1, %s769_s19 }
  0x11   : > { %1022 = vmatpush3.bf16.msra.mxu0 %v1276_v18  ;;  %v1060_v49 = vpack.c.bf16 %v288_v47, %v287_v46  ;;  %v251_v50 = vld [vmem:[%s231_s22] sm:$0xff]  ;;  %v252_v51 = vld [vmem:[%s231_s22 + $0x8] sm:$0xff]  ;;  %v253_v52 = vld [vmem:[%s231_s22 + $0x10] sm:$0xff]  ;;  %s245_s28 = scalar_lea.vmem %s1463_s4, %s771_s11 }
  0x12   : > { %1046 = vmatpush3.bf16.msra.mxu1 %v1280_v19  ;;  %1023 = vmatprep.subr.bf16.mxu0 %v1173_v3  ;;  %v254_v53 = vld [vmem:[%s239_s25] sm:$0xff]  ;;  %v255_v54 = vld [vmem:[%s239_s25 + $0x8] sm:$0xff]  ;;  %v256_v55 = vld [vmem:[%s239_s25 + $0x10] sm:$0xff] }
  0x13   : > { %1047 = vmatprep.subr.bf16.mxu1 %v1173_v3 }
  0x15   : > { %1025 = vmatpush3.bf16.msra.mxu0 %v1296_v24 }
  0x16   : > { %1049 = vmatpush3.bf16.msra.mxu1 %v1300_v25  ;;  %1026 = vmatprep.subr.bf16.mxu0 %v1173_v3 }
  0x17   : > { %1050 = vmatprep.subr.bf16.mxu1 %v1173_v3 }
  0x19   : > { %1028 = vmatpush3.bf16.msra.mxu0 %v1317_v30 }
  0x1a   : > { %1052 = vmatpush3.bf16.msra.mxu1 %v1321_v31  ;;  %1029 = vmatprep.subr.bf16.mxu0 %v1173_v3 }
  0x1b   : > { %1053 = vmatprep.subr.bf16.mxu1 %v1173_v3 }
  0x1d   : > { %1031 = vmatpush3.bf16.msra.mxu0 %v1337_v36 }
  0x1e   : > { %1055 = vmatpush3.bf16.msra.mxu1 %v1341_v37  ;;  %1032 = vmatprep.subr.bf16.mxu0 %v1173_v3 }
  0x1f   : > { %1056 = vmatprep.subr.bf16.mxu1 %v1173_v3 }
  0x21   : > { %1034 = vmatpush3.bf16.msra.mxu0 %v1033_v42 }
  0x22   : > { %1058 = vmatpush3.bf16.msra.mxu1 %v1057_v43  ;;  %1035 = vmatprep.subr.bf16.mxu0 %v1173_v3 }
  0x23   : > { %1059 = vmatprep.subr.bf16.mxu1 %v1173_v3 }
  0x25   : > { %1037 = vmatpush3.bf16.msra.mxu0 %v1036_v48 }
  0x26   : > { %1061 = vmatpush3.bf16.msra.mxu1 %v1060_v49  ;;  %1062 = vmatprep.subr.bf16.mxu0 %v1173_v3 }
  0x27   : > { %1086 = vmatprep.subr.bf16.mxu1 %v1173_v3 }
  0x28   : > { %883 = vmatmul.mubr.f32.vlgmr.msra.gmra.mrb[0].mxu0 %v251_v50 }
  0x29   : > { %924 = vmatmul.mubr.f32.vlgmr.msra.gmra.mrb[0].mxu1 %v251_v50  ;;  %1064 = vmatpush3.bf16.msra.mxu0 %v1232_v4 }
  0x2a   : > { %1088 = vmatpush3.bf16.msra.mxu1 %v1243_v8  ;;  %1065 = vmatprep.subr.bf16.mxu0 %v1173_v3 }
  0x2b   : > { %1089 = vmatprep.subr.bf16.mxu1 %v1173_v3  ;;  %885 = vmatprep.mubr.msk.f32.mxu0 %vm1174_vm0, %v1175_v11 }
  0x2c   : > { %926 = vmatprep.mubr.msk.f32.mxu1 %vm1174_vm0, %v1175_v11  ;;  %886 = vmatmul.mubr.f32.gmra.mrb[2].mxu0 %v252_v51 }
  0x2d   : > { %1067 = vmatpush3.bf16.msra.mxu0 %v1256_v12  ;;  %927 = vmatmul.mubr.f32.gmra.mrb[2].mxu1 %v252_v51 }
  0x2e   : > { %1091 = vmatpush3.bf16.msra.mxu1 %v1260_v13  ;;  %1068 = vmatprep.subr.bf16.mxu0 %v1173_v3 }
  0x2f   : > { %1092 = vmatprep.subr.bf16.mxu1 %v1173_v3  ;;  %888 = vmatprep.mubr.msk.f32.mxu0 %vm1174_vm0, %v1175_v11 }
  0x30   : > { %929 = vmatprep.mubr.msk.f32.mxu1 %vm1174_vm0, %v1175_v11  ;;  %889 = vmatmul.mubr.f32.gmra.mrb[4].mxu0 %v253_v52 }
  0x31   : > { %1070 = vmatpush3.bf16.msra.mxu0 %v1276_v18  ;;  %930 = vmatmul.mubr.f32.gmra.mrb[4].mxu1 %v253_v52 }
  0x32   : > { %1094 = vmatpush3.bf16.msra.mxu1 %v1280_v19  ;;  %1071 = vmatprep.subr.bf16.mxu0 %v1173_v3 }
  0x33   : > { %1095 = vmatprep.subr.bf16.mxu1 %v1173_v3  ;;  %964 = vmatprep.mubr.msk.f32.mxu0 %vm1174_vm0, %v1175_v11 }
  0x34   : > { %1005 = vmatprep.mubr.msk.f32.mxu1 %vm1174_vm0, %v1175_v11 }
  0x35   : > { %1073 = vmatpush3.bf16.msra.mxu0 %v1296_v24 }
  0x36   : > { %1097 = vmatpush3.bf16.msra.mxu1 %v1300_v25  ;;  %1074 = vmatprep.subr.bf16.mxu0 %v1173_v3 }
  0x37   : > { %1098 = vmatprep.subr.bf16.mxu1 %v1173_v3 }
  0x39   : > { %1076 = vmatpush3.bf16.msra.mxu0 %v1317_v30 }
  0x3a   : > { %1100 = vmatpush3.bf16.msra.mxu1 %v1321_v31  ;;  %1077 = vmatprep.subr.bf16.mxu0 %v1173_v3 }
  0x3b   : > { %1101 = vmatprep.subr.bf16.mxu1 %v1173_v3 }
  0x3d   : > { %1079 = vmatpush3.bf16.msra.mxu0 %v1337_v36 }
  0x3e   : > { %1103 = vmatpush3.bf16.msra.mxu1 %v1341_v37  ;;  %1080 = vmatprep.subr.bf16.mxu0 %v1173_v3 }
  0x3f   : > { %1104 = vmatprep.subr.bf16.mxu1 %v1173_v3 }
  0x41   : > { %1082 = vmatpush3.bf16.msra.mxu0 %v1033_v42 }
  0x42   : > { %1106 = vmatpush3.bf16.msra.mxu1 %v1057_v43  ;;  %1083 = vmatprep.subr.bf16.mxu0 %v1173_v3 }
  0x43   : > { %1107 = vmatprep.subr.bf16.mxu1 %v1173_v3 }
  0x45   : > { %1085 = vmatpush3.bf16.msra.mxu0 %v1036_v48 }
  0x46   : > { %1109 = vmatpush3.bf16.msra.mxu1 %v1060_v49 }
  0x48   : > { %965 = vmatmul.mubr.f32.vlgmr.msra.gmra.mrb[6].mxu0 %v254_v53 }
  0x49   : > { %1006 = vmatmul.mubr.f32.vlgmr.msra.gmra.mrb[6].mxu1 %v254_v53  ;;  %967 = vmatprep.mubr.msk.f32.mxu0 %vm1174_vm0, %v1175_v11 }
  0x4a   : > { %1008 = vmatprep.mubr.msk.f32.mxu1 %vm1174_vm0, %v1175_v11 }
  0x4c   : > { %968 = vmatmul.mubr.f32.gmra.mrb[8].mxu0 %v255_v54 }
  0x4d   : > { %1009 = vmatmul.mubr.f32.gmra.mrb[8].mxu1 %v255_v54  ;;  %970 = vmatprep.mubr.msk.f32.mxu0 %vm1174_vm0, %v1175_v11 }
  0x4e   : > { %1011 = vmatprep.mubr.msk.f32.mxu1 %vm1174_vm0, %v1175_v11 }
  0x50   : > { %971 = vmatmul.mubr.f32.gmra.mrb[10].mxu0 %v256_v55 }
  0x51   : > { %1012 = vmatmul.mubr.f32.gmra.mrb[10].mxu1 %v256_v55 }
  0xfb   : > { %v355_v56 = vpop.f32.mrb[0].mxu0 }
  0xfc   : > { %v609_v57 = vmul.f32 %v355_v56, %v355_v56  ;;  %v435_v58 = vpop.f32.mrb[0].mxu1  ;;  %v884_v59 = vpop.f32.mrb[1].mxu0 }
  0xfd   : > { %v612_v60 = vmul.f32 %v435_v58, %v435_v58  ;;  %v925_v61 = vpop.f32.mrb[1].mxu1 }
  0xff   : > { %v615_v62 = vadd.f32 %v612_v60, %v609_v57  ;;  %v360_v63 = vpop.f32.mrb[2].mxu0 }
 0x100   : > { %v610_v0 = vmul.f32 %v360_v63, %v360_v63  ;;  %v440_v1 = vpop.f32.mrb[2].mxu1  ;;  %v887_v2 = vpop.f32.mrb[3].mxu0 }
 0x101   : > { %v613_v3 = vmul.f32 %v440_v1, %v440_v1  ;;  %v928_v4 = vpop.f32.mrb[3].mxu1  ;;  %v618_v13 = vmax.f32 %v615_v62, 1e-07 }
 0x103   : > { %v365_v5 = vpop.f32.mrb[4].mxu0  ;;  %v616_v6 = vadd.f32 %v613_v3, %v610_v0  ;;  %1137 = vrsqrt.f32 %v618_v13  ;;  %vm623_vm1 = vcmp.eq.f32.partialorder %v618_v13, inf  ;;  %v626_v47 = vand.u32 2147483648, %v618_v13 }
 0x104   : > { %v611_v7 = vmul.f32 %v365_v5, %v365_v5  ;;  %v445_v8 = vpop.f32.mrb[4].mxu1  ;;  %v890_v9 = vpop.f32.mrb[5].mxu0  ;;  %vm625_vm3 = vcmp.eq.f32.partialorder %v618_v13, 0.0 }
 0x105   : > { %v614_v10 = vmul.f32 %v445_v8, %v445_v8  ;;  %v931_v11 = vpop.f32.mrb[5].mxu1  ;;  %v619_v20 = vmax.f32 %v616_v6, 1e-07 }
 0x107   : > { %v617_v12 = vadd.f32 %v614_v10, %v611_v7  ;;  %1139 = vrsqrt.f32 %v619_v20  ;;  %vm630_vm4 = vcmp.eq.f32.partialorder %v619_v20, inf  ;;  %v633_v54 = vand.u32 2147483648, %v619_v20 }
 0x108   : > { %vm632_vm6 = vcmp.eq.f32.partialorder %v619_v20, 0.0 }
 0x109   : > { %v1435_v26 = vmax.f32 %v617_v12, 1e-07 }
 0x10b   : > { %vm637_vm7 = vcmp.eq.f32.partialorder %v1435_v26, inf  ;;  %vm639_vm9 = vcmp.eq.f32.partialorder %v1435_v26, 0.0  ;;  %v640_v61 = vand.u32 2147483648, %v1435_v26 }
 0x10d   : > { %v1138_v38 = vpop.eup %1137 }
 0x10e   : > { %v622_v41 = vmul.f32 %v1138_v38, %v618_v13 }
 0x110   : > { %v624_v44 = vsel %vm623_vm1, %v618_v13, %v622_v41 }
 0x111   : > { %v1140_v42 = vpop.eup %1139  ;;  %v627_v51 = vsel %vm625_vm3, %v626_v47, %v624_v44 }
 0x112   : > { %v629_v48 = vmul.f32 %v1140_v42, %v619_v20 }
 0x114   : > { %v631_v57 = vsel %vm630_vm4, %v619_v20, %v629_v48 }
 0x115   : > { %v634_v63 = vsel %vm632_vm6, %v633_v54, %v631_v57 }
 0x11b   : > { %v515_v14 = vpop.f32.mrb[6].mxu0 }
 0x11c   : > { %v642_v15 = vmul.f32 %v515_v14, %v515_v14  ;;  %v595_v16 = vpop.f32.mrb[6].mxu1  ;;  %v966_v17 = vpop.f32.mrb[7].mxu0 }
 0x11d   : > { %v645_v18 = vmul.f32 %v595_v16, %v595_v16  ;;  %v1007_v19 = vpop.f32.mrb[7].mxu1 }
 0x11f   : > { %v648_v21 = vadd.f32 %v645_v18, %v642_v15  ;;  %v520_v22 = vpop.f32.mrb[8].mxu0 }
 0x120   : > { %v643_v23 = vmul.f32 %v520_v22, %v520_v22  ;;  %v600_v24 = vpop.f32.mrb[8].mxu1  ;;  %v969_v25 = vpop.f32.mrb[9].mxu0 }
 0x121   : > { %v651_v27 = vmax.f32 %v648_v21, 1e-07  ;;  %v646_v28 = vmul.f32 %v600_v24, %v600_v24  ;;  %v1010_v29 = vpop.f32.mrb[9].mxu1 }
 0x123   : > { %1141 = vrsqrt.f32 %v651_v27  ;;  %v525_v30 = vpop.f32.mrb[10].mxu0  ;;  %v649_v31 = vadd.f32 %v646_v28, %v643_v23  ;;  %vm656_vm2 = vcmp.eq.f32.partialorder %v651_v27, inf  ;;  %v659_v49 = vand.u32 2147483648, %v651_v27 }
 0x124   : > { %v644_v32 = vmul.f32 %v525_v30, %v525_v30  ;;  %v605_v33 = vpop.f32.mrb[10].mxu1  ;;  %v972_v34 = vpop.f32.mrb[11].mxu0  ;;  %1143 = vrsqrt.f32 %v1435_v26  ;;  %vm658_vm5 = vcmp.eq.f32.partialorder %v651_v27, 0.0 }
 0x125   : > { %v647_v35 = vmul.f32 %v605_v33, %v605_v33  ;;  %v1013_v36 = vpop.f32.mrb[11].mxu1  ;;  %v652_v37 = vmax.f32 %v649_v31, 1e-07 }
 0x127   : > { %v650_v39 = vadd.f32 %v647_v35, %v644_v32  ;;  %1145 = vrsqrt.f32 %v652_v37  ;;  %vm663_vm8 = vcmp.eq.f32.partialorder %v652_v37, inf  ;;  %v666_v59 = vand.u32 2147483648, %v652_v37 }
 0x128   : > { %vm665_vm10 = vcmp.eq.f32.partialorder %v652_v37, 0.0 }
 0x129   : > { %v653_v40 = vmax.f32 %v650_v39, 1e-07 }
 0x12b   : > { %1147 = vrsqrt.f32 %v653_v40  ;;  %vm670_vm11 = vcmp.eq.f32.partialorder %v653_v40, inf  ;;  %v673_v4 = vand.u32 2147483648, %v653_v40  ;;  %vm672_vm12 = vcmp.eq.f32.partialorder %v653_v40, 0.0 }
 0x12d   : > { %v1142_v43 = vpop.eup %1141 }
 0x12e   : > { %v655_v45 = vmul.f32 %v1142_v43, %v651_v27  ;;  %v1144_v46 = vpop.eup %1143 }
 0x12f   : > { %v636_v55 = vmul.f32 %v1144_v46, %v1435_v26 }
 0x130   : > { %v657_v50 = vsel %vm656_vm2, %v651_v27, %v655_v45 }
 0x131   : > { %v660_v52 = vsel %vm658_vm5, %v659_v49, %v657_v50  ;;  %v1146_v53 = vpop.eup %1145  ;;  %v638_v0 = vsel %vm637_vm7, %v1435_v26, %v636_v55 }
 0x132   : > { %v675_v56 = vsub.f32 %v627_v51, %v660_v52  ;;  %v662_v58 = vmul.f32 %v1146_v53, %v652_v37  ;;  %v641_v6 = vsel %vm639_vm9, %v640_v61, %v638_v0 }
 0x134   : > { %v664_v62 = vsel %vm663_vm8, %v652_v37, %v662_v58  ;;  %v678_v7 = vand.u32 2147483647, %v675_v56 }
 0x135   : > { %v1148_v60 = vpop.eup %1147  ;;  %v667_v1 = vsel %vm665_vm10, %v666_v59, %v664_v62 }
 0x136   : > { %v669_v2 = vmul.f32 %v1148_v60, %v653_v40  ;;  %v676_v3 = vsub.f32 %v634_v63, %v667_v1 }
 0x138   : > { %v671_v5 = vsel %vm670_vm11, %v653_v40, %v669_v2  ;;  %v679_v8 = vand.u32 2147483647, %v676_v3 }
 0x139   : > { %v674_v9 = vsel %vm672_vm12, %v673_v4, %v671_v5 }
 0x13a   : > { %v677_v10 = vsub.f32 %v641_v6, %v674_v9  ;;  %v682_v11 = vadd.f32 %v679_v8, %v678_v7 }
 0x13c   : > { %v680_v12 = vand.u32 2147483647, %v677_v10 }
 0x13e   : > { %v683_v13 = vadd.f32 %v682_v11, %v680_v12 }
 0x140   : > { %690 = vst [vmem:[%s245_s28] sm:$0xff] %v683_v13 }
 0x141 PF: > { %s14_s17 = sadd.s32 1, %s1171_s17   ;;  %s1464_s15 = smov %s1167_s16 }
 0x142   : > { %p11_p6 = scmp.ge.s32.totalorder %s14_s17, 4   ;;  %s1465_s16 = smov %s1467_s18 }
 0x144   :  { %13 = sbr.rel (!%p11_p6) target bundleno = 2 (0x2), region = 77 }

</bundles_post_ra>
